<compile_context>
chip_gen: v5e
topology: v5e:2x2
jax: 0.10.0
libtpu: 0.0.40
codegen_flags: <defaults>
</compile_context>

<pallas_src>
import functools

import numpy as np
import jax
import jax.numpy as jnp
from jax import lax
from jax.experimental import pallas as pl
from jax.experimental.pallas import tpu as pltpu


def _round_up(a, m):
    return ((a + m - 1) // m) * m


def _default_block_rows():
    """256 targets the 2x256^2 MXU on v6e/v7x; 128 suits v5e (4x128^2) & older."""
    try:
        kind = jax.devices()[0].device_kind.lower()
    except Exception:
        return 128
    return 256 if any(t in kind for t in ("v6", "v7", "7x")) else 128


def _cdist_pairs_kernel(ii_ref, jj_ref, ww_ref, mm_ref,      # SMEM prefetch
                        xi_ref, xj_ref, sqi_ref, sqj_ref,    # VMEM inputs
                        out_ref,                             # VMEM output
                        *, n_rows, tm, ppc, inv_norm, upcast):
    """One upper-triangle block pair per grid step.

    xi_ref : (tm, D)      rows of block i (zero-padded past n_rows)
    xj_ref : (tm, D)      rows of block j
    sqi_ref: (1, tm, 1)   f32 squared norms of block-i rows
    sqj_ref: (1, 1, tm)   f32 squared norms of block-j rows
    out_ref: (1, 8, 128)  per-core-row partial sum (broadcast over the block)
    """
    c = pl.program_id(0)
    p = pl.program_id(1)
    s = c * ppc + p                      # flat slot into the prefetch tables

    @pl.when(p == 0)
    def _init():
        out_ref[...] = jnp.zeros_like(out_ref)

    w = ww_ref[s]                        # 0 = dummy pad slot, 1 = diag, 2 = off-diag

    @pl.when(w > 0)
    def _compute():
        xi = xi_ref[...]
        xj = xj_ref[...]
        if upcast:
            # bf16/f16 inputs: run the Gram product in f32 so the
            # ||a||^2 + ||b||^2 - 2<a,b> identity doesn't cancel catastrophically.
            xi = xi.astype(jnp.float32)
            xj = xj.astype(jnp.float32)
        # Fold the -2 into the small (tm, D) operand (exact scale) instead of
        # multiplying the (tm, tm) Gram tile on the VPU.
        xj_m2 = xj * (-2.0)
        gram_m2 = lax.dot_general(                     # -2 <x_i, x_j>  on the MXU
            xi, xj_m2,
            dimension_numbers=(((1,), (1,)), ((), ())),
            preferred_element_type=jnp.float32)

        # Norms were precomputed once in the wrapper (f32) -> no per-tile
        # reductions / transposes on the XLU.
        d2 = jnp.maximum(sqi_ref[0] + sqj_ref[0] + gram_m2, 0.0)   # (tm, tm)
        dist = jnp.sqrt(d2)                                        # sqrt(0) == 0

        wf = w.astype(jnp.float32)                    # symmetry doubling factor
        needs_mask = mm_ref[s] > 0

        @pl.when(needs_mask)                          # diagonal / padded edge pairs
        def _masked():
            i = ii_ref[s]
            j = jj_ref[s]
            rows = i * tm + lax.broadcasted_iota(jnp.int32, (tm, 1), 0)
            cols = j * tm + lax.broadcasted_iota(jnp.int32, (1, tm), 1)
            keep = jnp.logical_and(
                jnp.logical_and(rows < n_rows, cols < n_rows), rows != cols)
            out_ref[...] += wf * jnp.sum(jnp.where(keep, dist, 0.0))

        @pl.when(jnp.logical_not(needs_mask))         # interior pairs: no mask work
        def _clean():
            out_ref[...] += wf * jnp.sum(dist)

    # Fold the /B^2 normalization into the last grid step of this core row.
    @pl.when(p == pl.num_programs(1) - 1)
    def _finalize():
        out_ref[...] = out_ref[...] * inv_norm


def pairwise_distance_between_minima(phis, norm_degree=2, block_rows=None):
    """JAX/Pallas equivalent of PairwiseDistanceBetweenMinima.forward.

    phis: (B, T, D) array.  Returns a scalar f32 jax array.
    """
    assert norm_degree == 2, "only p=2 (Euclidean) implemented"
    b, t, d = phis.shape

    # Last-timestep select stays in plain JAX (single strided HBM pass).
    x = phis[:, -1, :]
    print((1, b, d))   # mirrors the `print(phis.shape)` in the torch module

    if block_rows is None:
        block_rows = _default_block_rows()

    # dtype-native sublane tile: 8 rows for f32, 16 for bf16, 32 for int8/fp8.
    sublane = max(8, 32 // np.dtype(x.dtype).itemsize)
    tm = min(_round_up(block_rows, sublane), _round_up(b, sublane))
    nb = (b + tm - 1) // tm
    bp = nb * tm

    if bp != b:  # zero-pad rows -> no garbage ever reaches the MXU
        x = jnp.pad(x, ((0, bp - b), (0, 0)))

    # Row squared norms: computed once here (f32), not once per (i, j) tile.
    xf = x.astype(jnp.float32)
    sq = jnp.sum(xf * xf, axis=-1)       # (bp,) -- padded rows are exactly 0
    sq_col = sq.reshape(nb, tm, 1)       # broadcasts over tile rows
    sq_row = sq.reshape(nb, 1, tm)       # broadcasts over tile cols

    # Static upper-triangle block-pair schedule (no lower-triangle no-op steps),
    # dealt round-robin over `ncores` grid rows so v7x's two TensorCores get a
    # balanced share of the triangular work.
    pairs = [(i, j) for i in range(nb) for j in range(i, nb)]
    n_pairs = len(pairs)
    ncores = 2 if n_pairs >= 2 else 1
    ppc = (n_pairs + ncores - 1) // ncores
    has_pad = (b % tm) != 0

    ii_np = np.zeros(ncores * ppc, np.int32)
    jj_np = np.zeros(ncores * ppc, np.int32)
    ww_np = np.zeros(ncores * ppc, np.int32)   # 0 dummy, 1 diag pair, 2 off-diag
    mm_np = np.zeros(ncores * ppc, np.int32)   # 1 -> needs pad/diag mask
    for k, (i, j) in enumerate(pairs):
        c, slot = k % ncores, k // ncores
        idx = c * ppc + slot
        ii_np[idx] = i
        jj_np[idx] = j
        ww_np[idx] = 1 if i == j else 2
        mm_np[idx] = 1 if (i == j or (has_pad and (i == nb - 1 or j == nb - 1))) else 0

    kernel = functools.partial(
        _cdist_pairs_kernel, n_rows=b, tm=tm, ppc=ppc,
        inv_norm=1.0 / float(b * b), upcast=(x.dtype != jnp.float32))

    grid_spec = pltpu.PrefetchScalarGridSpec(
        num_scalar_prefetch=4,
        grid=(ncores, ppc),
        in_specs=[
            pl.BlockSpec((tm, d), lambda c, p, ii, jj, ww, mm: (ii[c * ppc + p], 0)),
            pl.BlockSpec((tm, d), lambda c, p, ii, jj, ww, mm: (jj[c * ppc + p], 0)),
            pl.BlockSpec((1, tm, 1),
                         lambda c, p, ii, jj, ww, mm: (ii[c * ppc + p], 0, 0)),
            pl.BlockSpec((1, 1, tm),
                         lambda c, p, ii, jj, ww, mm: (jj[c * ppc + p], 0, 0)),
        ],
        # One lane-dense accumulator block per core row; revisited only across
        # the p (reduction) axis.
        out_specs=pl.BlockSpec((1, 8, 128),
                               lambda c, p, ii, jj, ww, mm: (c, 0, 0)),
    )

    partials = pl.pallas_call(
        kernel,
        out_shape=jax.ShapeDtypeStruct((ncores, 8, 128), jnp.float32),
        grid_spec=grid_spec,
        compiler_params=pltpu.CompilerParams(
            # Core-row axis is independent -> "parallel" (on v7x switch to
            # pltpu.CORE_PARALLEL if plain "parallel" does not shard across
            # the two TensorCores); pair axis is the accumulation -> arbitrary.
            dimension_semantics=("parallel", "arbitrary"),
            # 32 MiB scoped VMEM: fits v7x's 64 MiB physical VMEM with headroom
            # (per-step footprint = 2 double-buffered (tm, D) tiles + ~4
            # (tm, tm) f32 intermediates ~ 1.3 MiB at tm=256, D=32).
            vmem_limit_bytes=32 * 1024 * 1024,
        ),
    )(jnp.asarray(ii_np), jnp.asarray(jj_np), jnp.asarray(ww_np),
      jnp.asarray(mm_np), x, x, sq_col, sq_row)

    # Normalization already happened in-kernel; only a <=2 element sum remains.
    # TODO(synk): torch's `.item()` returns a host Python float; we return a
    # device scalar instead so the wrapper stays jit-compatible.
    return jnp.sum(partials[:, 0, 0])


def _reference_f64(phis):
    """High-precision ground truth (numpy float64, direct differencing)."""
    x = np.asarray(phis[:, -1, :]).astype(np.float64)
    diff = x[:, None, :] - x[None, :, :]
    return float(np.sqrt((diff ** 2).sum(-1)).mean())


if __name__ == "__main__":
    key = jax.random.PRNGKey(0)
    k1, k2, k3 = jax.random.split(key, 3)

    # Production-sized case: nb == 1, single block pair, everything (including
    # the /B^2 normalize) happens inside one grid step.
    B, T, D = 8, 8, 32
    phis = jax.random.normal(k1, (B, T, D), dtype=jnp.float32)
    result = jax.block_until_ready(pairwise_distance_between_minima(phis))
    ref = _reference_f64(phis)
    assert abs(float(result) - ref) <= 2e-4 * abs(ref) + 1e-5, (float(result), ref)

    # Multi-block case with padding: 3x3 block grid -> 6 upper-triangle pairs,
    # split over 2 core rows (one dummy slot), diag/edge masks + doubling.
    B2, T2, D2 = 20, 3, 32
    phis2 = jax.random.normal(k2, (B2, T2, D2), dtype=jnp.float32)
    result2 = jax.block_until_ready(
        pairwise_distance_between_minima(phis2, block_rows=8))
    ref2 = _reference_f64(phis2)
    assert abs(float(result2) - ref2) <= 2e-4 * abs(ref2) + 1e-5, (
        float(result2), ref2)

    # bf16 inputs: 16-row sublane tile + f32 upcast for the Gram product.
    B3, T3, D3 = 12, 4, 32
    phis3 = jax.random.normal(k3, (B3, T3, D3), dtype=jnp.float32).astype(
        jnp.bfloat16)
    result3 = jax.block_until_ready(pairwise_distance_between_minima(phis3))
    ref3 = _reference_f64(phis3)
    assert abs(float(result3) - ref3) <= 1e-3 * abs(ref3) + 1e-5, (
        float(result3), ref3)

    print("KERNEL_OK")
</pallas_src>

<mosaic_0001>
module attributes {stable_mosaic.version = 11 : i64} {
  func.func @_cdist_pairs_kernel(%arg0: i32, %arg1: i32, %arg2: memref<1xi32, #tpu.memory_space<smem>>, %arg3: memref<1xi32, #tpu.memory_space<smem>>, %arg4: memref<1xi32, #tpu.memory_space<smem>>, %arg5: memref<1xi32, #tpu.memory_space<smem>>, %arg6: memref<8x32xf32, #tpu.memory_space<vmem>>, %arg7: memref<8x32xf32, #tpu.memory_space<vmem>>, %arg8: memref<1x8x1xf32, #tpu.memory_space<vmem>>, %arg9: memref<1x1x8xf32, #tpu.memory_space<vmem>>, %arg10: memref<1x8x128xf32, #tpu.memory_space<vmem>>) attributes {dimension_semantics = [#tpu.dimension_semantics<parallel>, #tpu.dimension_semantics<arbitrary>], iteration_bounds = array<i64: 1, 1>, scalar_prefetch = 4 : i64, scratch_operands = 0 : i64, tpu.core_type = #tpu.core_type<tc>, window_params = [{transform_indices = @transform_0, window_bounds = array<i64: 8, 32>}, {transform_indices = @transform_1, window_bounds = array<i64: 8, 32>}, {transform_indices = @transform_2, window_bounds = array<i64: 1, 8, 1>}, {transform_indices = @transform_3, window_bounds = array<i64: 1, 1, 8>}, {transform_indices = @transform_4, window_bounds = array<i64: 1, 8, 128>}]} {
    %c1_i32 = arith.constant 1 : i32
    %0 = arith.muli %arg0, %c1_i32 : i32
    %1 = arith.addi %0, %arg1 : i32
    %c0_i32 = arith.constant 0 : i32
    %2 = arith.cmpi eq, %arg1, %c0_i32 : i32
    %3 = arith.extui %2 : i1 to i32
    %c0_i32_0 = arith.constant 0 : i32
    %4 = arith.cmpi ne, %3, %c0_i32_0 : i32
    scf.if %4 {
      %cst = arith.constant 0.000000e+00 : f32
      %13 = vector.broadcast %cst : f32 to vector<1x8x128xf32>
      %c0 = arith.constant 0 : index
      %c0_5 = arith.constant 0 : index
      %c0_6 = arith.constant 0 : index
      %14 = vector.load %arg10[%c0, %c0_5, %c0_6] : memref<1x8x128xf32, #tpu.memory_space<vmem>>, vector<1x8x128xf32>
      tpu.vector_store %arg10[%c0, %c0_5, %c0_6], %13 {strides = array<i32>} : memref<1x8x128xf32, #tpu.memory_space<vmem>>, vector<1x8x128xf32>,
    } else {
    }
    %5 = arith.index_cast %1 : i32 to index
    %6 = memref.load %arg4[%5] : memref<1xi32, #tpu.memory_space<smem>>
    %c0_i32_1 = arith.constant 0 : i32
    %7 = arith.cmpi sgt, %6, %c0_i32_1 : i32
    %8 = arith.extui %7 : i1 to i32
    %c0_i32_2 = arith.constant 0 : i32
    %9 = arith.cmpi ne, %8, %c0_i32_2 : i32
    scf.if %9 {
      %c0 = arith.constant 0 : index
      %c0_5 = arith.constant 0 : index
      %13 = vector.load %arg6[%c0, %c0_5] : memref<8x32xf32, #tpu.memory_space<vmem>>, vector<8x32xf32>
      %c0_6 = arith.constant 0 : index
      %c0_7 = arith.constant 0 : index
      %14 = vector.load %arg7[%c0_6, %c0_7] : memref<8x32xf32, #tpu.memory_space<vmem>>, vector<8x32xf32>
      %cst = arith.constant -2.000000e+00 : f32
      %15 = vector.broadcast %cst : f32 to vector<8x32xf32>
      %16 = arith.mulf %14, %15 : vector<8x32xf32>
      %cst_8 = arith.constant dense<0.000000e+00> : vector<8x8xf32>
      %17 = tpu.matmul %13, %16, %cst_8 {dimension_numbers = #tpu.dot_dimension_numbers<[1], [1], [0], [0], [0, 0, 1, 0], [], []>} : vector<8x32xf32>, vector<8x32xf32>, vector<8x8xf32> -> vector<8x8xf32>
      %c0_9 = arith.constant 0 : index
      %c0_10 = arith.constant 0 : index
      %c0_11 = arith.constant 0 : index
      %18 = vector.load %arg8[%c0_9, %c0_10, %c0_11] : memref<1x8x1xf32, #tpu.memory_space<vmem>>, vector<1x8x1xf32>
      %19 = vector.shape_cast %18 : vector<1x8x1xf32> to vector<8x1xf32>
      %c0_12 = arith.constant 0 : index
      %c0_13 = arith.constant 0 : index
      %c0_14 = arith.constant 0 : index
      %20 = vector.load %arg9[%c0_12, %c0_13, %c0_14] : memref<1x1x8xf32, #tpu.memory_space<vmem>>, vector<1x1x8xf32>
      %21 = vector.shape_cast %20 : vector<1x1x8xf32> to vector<1x8xf32>
      %22 = vector.broadcast %19 : vector<8x1xf32> to vector<8x8xf32>
      %23 = vector.broadcast %21 : vector<1x8xf32> to vector<8x8xf32>
      %24 = arith.addf %22, %23 : vector<8x8xf32>
      %25 = arith.addf %24, %17 : vector<8x8xf32>
      %cst_15 = arith.constant 0.000000e+00 : f32
      %26 = vector.broadcast %cst_15 : f32 to vector<8x8xf32>
      %27 = arith.maximumf %25, %26 : vector<8x8xf32>
      %28 = math.sqrt %27 : vector<8x8xf32>
      %29 = arith.sitofp %6 : i32 to f32
      %30 = arith.index_cast %1 : i32 to index
      %31 = memref.load %arg5[%30] : memref<1xi32, #tpu.memory_space<smem>>
      %c0_i32_16 = arith.constant 0 : i32
      %32 = arith.cmpi sgt, %31, %c0_i32_16 : i32
      %33 = arith.extui %32 : i1 to i32
      %c0_i32_17 = arith.constant 0 : i32
      %34 = arith.cmpi ne, %33, %c0_i32_17 : i32
      scf.if %34 {
        %38 = arith.index_cast %1 : i32 to index
        %39 = memref.load %arg2[%38] : memref<1xi32, #tpu.memory_space<smem>>
        %40 = arith.index_cast %1 : i32 to index
        %41 = memref.load %arg3[%40] : memref<1xi32, #tpu.memory_space<smem>>
        %c8_i32 = arith.constant 8 : i32
        %42 = arith.muli %39, %c8_i32 : i32
        %43 = tpu.iota {dimensions = array<i32: 0>} : vector<8x1xi32>
        %44 = vector.broadcast %42 : i32 to vector<8x1xi32>
        %45 = arith.addi %44, %43 : vector<8x1xi32>
        %c8_i32_19 = arith.constant 8 : i32
        %46 = arith.muli %41, %c8_i32_19 : i32
        %47 = tpu.iota {dimensions = array<i32: 1>} : vector<1x8xi32>
        %48 = vector.broadcast %46 : i32 to vector<1x8xi32>
        %49 = arith.addi %48, %47 : vector<1x8xi32>
        %c8_i32_20 = arith.constant 8 : i32
        %50 = vector.broadcast %c8_i32_20 : i32 to vector<8x1xi32>
        %51 = arith.cmpi slt, %45, %50 : vector<8x1xi32>
        %c8_i32_21 = arith.constant 8 : i32
        %52 = vector.broadcast %c8_i32_21 : i32 to vector<1x8xi32>
        %53 = arith.cmpi slt, %49, %52 : vector<1x8xi32>
        %54 = vector.broadcast %51 : vector<8x1xi1> to vector<8x8xi1>
        %55 = vector.broadcast %53 : vector<1x8xi1> to vector<8x8xi1>
        %56 = arith.andi %54, %55 : vector<8x8xi1>
        %57 = vector.broadcast %45 : vector<8x1xi32> to vector<8x8xi32>
        %58 = vector.broadcast %49 : vector<1x8xi32> to vector<8x8xi32>
        %59 = arith.cmpi ne, %57, %58 : vector<8x8xi32>
        %60 = arith.andi %56, %59 : vector<8x8xi1>
        %c0_22 = arith.constant 0 : index
        %c0_23 = arith.constant 0 : index
        %c0_24 = arith.constant 0 : index
        %61 = vector.load %arg10[%c0_22, %c0_23, %c0_24] : memref<1x8x128xf32, #tpu.memory_space<vmem>>, vector<1x8x128xf32>
        %cst_25 = arith.constant 0.000000e+00 : f32
        %62 = vector.broadcast %cst_25 : f32 to vector<8x8xf32>
        %63 = arith.select %60, %28, %62 : vector<8x8xi1>, vector<8x8xf32>
        %64 = vector.shape_cast %63 : vector<8x8xf32> to vector<1x8x8xf32>
        %cst_26 = arith.constant dense<0.000000e+00> : vector<1xf32>
        %65 = vector.multi_reduction <add>, %64, %cst_26 [1, 2] : vector<1x8x8xf32> to vector<1xf32>
        %66 = vector.shape_cast %65 : vector<1xf32> to vector<1x1x1xf32>
        %67 = vector.extract %66[0, 0, 0] : f32 from vector<1x1x1xf32>
        %68 = arith.mulf %29, %67 : f32
        %69 = vector.broadcast %68 : f32 to vector<1x8x128xf32>
        %70 = arith.addf %61, %69 : vector<1x8x128xf32>
        %c0_27 = arith.constant 0 : index
        %c0_28 = arith.constant 0 : index
        %c0_29 = arith.constant 0 : index
        %71 = vector.load %arg10[%c0_27, %c0_28, %c0_29] : memref<1x8x128xf32, #tpu.memory_space<vmem>>, vector<1x8x128xf32>
        tpu.vector_store %arg10[%c0_27, %c0_28, %c0_29], %70 {strides = array<i32>} : memref<1x8x128xf32, #tpu.memory_space<vmem>>, vector<1x8x128xf32>,
      } else {
      }
      %true = arith.constant true
      %35 = arith.xori %32, %true : i1
      %36 = arith.extui %35 : i1 to i32
      %c0_i32_18 = arith.constant 0 : i32
      %37 = arith.cmpi ne, %36, %c0_i32_18 : i32
      scf.if %37 {
        %c0_19 = arith.constant 0 : index
        %c0_20 = arith.constant 0 : index
        %c0_21 = arith.constant 0 : index
        %38 = vector.load %arg10[%c0_19, %c0_20, %c0_21] : memref<1x8x128xf32, #tpu.memory_space<vmem>>, vector<1x8x128xf32>
        %39 = vector.shape_cast %28 : vector<8x8xf32> to vector<1x8x8xf32>
        %cst_22 = arith.constant dense<0.000000e+00> : vector<1xf32>
        %40 = vector.multi_reduction <add>, %39, %cst_22 [1, 2] : vector<1x8x8xf32> to vector<1xf32>
        %41 = vector.shape_cast %40 : vector<1xf32> to vector<1x1x1xf32>
        %42 = vector.extract %41[0, 0, 0] : f32 from vector<1x1x1xf32>
        %43 = arith.mulf %29, %42 : f32
        %44 = vector.broadcast %43 : f32 to vector<1x8x128xf32>
        %45 = arith.addf %38, %44 : vector<1x8x128xf32>
        %c0_23 = arith.constant 0 : index
        %c0_24 = arith.constant 0 : index
        %c0_25 = arith.constant 0 : index
        %46 = vector.load %arg10[%c0_23, %c0_24, %c0_25] : memref<1x8x128xf32, #tpu.memory_space<vmem>>, vector<1x8x128xf32>
        tpu.vector_store %arg10[%c0_23, %c0_24, %c0_25], %45 {strides = array<i32>} : memref<1x8x128xf32, #tpu.memory_space<vmem>>, vector<1x8x128xf32>,
      } else {
      }
    } else {
    }
    %c0_i32_3 = arith.constant 0 : i32
    %10 = arith.cmpi eq, %arg1, %c0_i32_3 : i32
    %11 = arith.extui %10 : i1 to i32
    %c0_i32_4 = arith.constant 0 : i32
    %12 = arith.cmpi ne, %11, %c0_i32_4 : i32
    scf.if %12 {
      %c0 = arith.constant 0 : index
      %c0_5 = arith.constant 0 : index
      %c0_6 = arith.constant 0 : index
      %13 = vector.load %arg10[%c0, %c0_5, %c0_6] : memref<1x8x128xf32, #tpu.memory_space<vmem>>, vector<1x8x128xf32>
      %cst = arith.constant 1.562500e-02 : f32
      %14 = vector.broadcast %cst : f32 to vector<1x8x128xf32>
      %15 = arith.mulf %13, %14 : vector<1x8x128xf32>
      %c0_7 = arith.constant 0 : index
      %c0_8 = arith.constant 0 : index
      %c0_9 = arith.constant 0 : index
      %16 = vector.load %arg10[%c0_7, %c0_8, %c0_9] : memref<1x8x128xf32, #tpu.memory_space<vmem>>, vector<1x8x128xf32>
      tpu.vector_store %arg10[%c0_7, %c0_8, %c0_9], %15 {strides = array<i32>} : memref<1x8x128xf32, #tpu.memory_space<vmem>>, vector<1x8x128xf32>,
    } else {
    }
    return
  }
  func.func @transform_0(%arg0: i32, %arg1: i32, %arg2: memref<1xi32, #tpu.memory_space<smem>>, %arg3: memref<1xi32, #tpu.memory_space<smem>>, %arg4: memref<1xi32, #tpu.memory_space<smem>>, %arg5: memref<1xi32, #tpu.memory_space<smem>>) -> (i32, i32) {
    %c1_i32 = arith.constant 1 : i32
    %0 = arith.muli %arg0, %c1_i32 : i32
    %1 = arith.addi %0, %arg1 : i32
    %2 = arith.index_cast %1 : i32 to index
    %3 = memref.load %arg2[%2] : memref<1xi32, #tpu.memory_space<smem>>
    %c0_i32 = arith.constant 0 : i32
    %c0_i32_0 = arith.constant 0 : i32
    return %3, %c0_i32 : i32, i32
  }
  func.func @transform_1(%arg0: i32, %arg1: i32, %arg2: memref<1xi32, #tpu.memory_space<smem>>, %arg3: memref<1xi32, #tpu.memory_space<smem>>, %arg4: memref<1xi32, #tpu.memory_space<smem>>, %arg5: memref<1xi32, #tpu.memory_space<smem>>) -> (i32, i32) {
    %c1_i32 = arith.constant 1 : i32
    %0 = arith.muli %arg0, %c1_i32 : i32
    %1 = arith.addi %0, %arg1 : i32
    %2 = arith.index_cast %1 : i32 to index
    %3 = memref.load %arg3[%2] : memref<1xi32, #tpu.memory_space<smem>>
    %c0_i32 = arith.constant 0 : i32
    %c0_i32_0 = arith.constant 0 : i32
    return %3, %c0_i32 : i32, i32
  }
  func.func @transform_2(%arg0: i32, %arg1: i32, %arg2: memref<1xi32, #tpu.memory_space<smem>>, %arg3: memref<1xi32, #tpu.memory_space<smem>>, %arg4: memref<1xi32, #tpu.memory_space<smem>>, %arg5: memref<1xi32, #tpu.memory_space<smem>>) -> (i32, i32, i32) {
    %c1_i32 = arith.constant 1 : i32
    %0 = arith.muli %arg0, %c1_i32 : i32
    %1 = arith.addi %0, %arg1 : i32
    %2 = arith.index_cast %1 : i32 to index
    %3 = memref.load %arg2[%2] : memref<1xi32, #tpu.memory_space<smem>>
    %c0_i32 = arith.constant 0 : i32
    %c0_i32_0 = arith.constant 0 : i32
    %c0_i32_1 = arith.constant 0 : i32
    return %3, %c0_i32, %c0_i32_0 : i32, i32, i32
  }
  func.func @transform_3(%arg0: i32, %arg1: i32, %arg2: memref<1xi32, #tpu.memory_space<smem>>, %arg3: memref<1xi32, #tpu.memory_space<smem>>, %arg4: memref<1xi32, #tpu.memory_space<smem>>, %arg5: memref<1xi32, #tpu.memory_space<smem>>) -> (i32, i32, i32) {
    %c1_i32 = arith.constant 1 : i32
    %0 = arith.muli %arg0, %c1_i32 : i32
    %1 = arith.addi %0, %arg1 : i32
    %2 = arith.index_cast %1 : i32 to index
    %3 = memref.load %arg3[%2] : memref<1xi32, #tpu.memory_space<smem>>
    %c0_i32 = arith.constant 0 : i32
    %c0_i32_0 = arith.constant 0 : i32
    %c0_i32_1 = arith.constant 0 : i32
    return %3, %c0_i32, %c0_i32_0 : i32, i32, i32
  }
  func.func @transform_4(%arg0: i32, %arg1: i32, %arg2: memref<1xi32, #tpu.memory_space<smem>>, %arg3: memref<1xi32, #tpu.memory_space<smem>>, %arg4: memref<1xi32, #tpu.memory_space<smem>>, %arg5: memref<1xi32, #tpu.memory_space<smem>>) -> (i32, i32, i32) {
    %c0_i32 = arith.constant 0 : i32
    %c0_i32_0 = arith.constant 0 : i32
    %c0_i32_1 = arith.constant 0 : i32
    return %arg0, %c0_i32, %c0_i32_0 : i32, i32, i32
  }
}

</mosaic_0001>

<bundles_post_ra>
// kernel: tpu_custom_call.1
= control target key start
LH: loop header
LB: loop body
LE: loop exit
PB: predicated region body
PF: predicated region fallthrough
CT: control target
= control target key end

     0   :  { %s450_s0 = inlined_call_operand.<no memory space> [shape: s32[1], index: 0, kind: input, shape index: {}]   ;;  %s451_s1 = inlined_call_operand.<no memory space> [shape: s32[1], index: 1, kind: input, shape index: {}]   ;;  %s452_s2 = inlined_call_operand.<no memory space> [shape: s32[1], index: 2, kind: input, shape index: {}]   ;;  %s453_s3 = inlined_call_operand.<no memory space> [shape: s32[1], index: 3, kind: input, shape index: {}]   ;;  %s454_s4 = inlined_call_operand.vmem [shape: f32[8,32], index: 4, kind: input, shape index: {}]   ;;  %s455_s5 = inlined_call_operand.hbm [shape: f32[8,32], index: 5, kind: input, shape index: {}]   ;;  %s456_s6 = inlined_call_operand.vmem [shape: f32[1,8,1], index: 6, kind: input, shape index: {}]   ;;  %s457_s7 = inlined_call_operand.vmem [shape: f32[1,1,8], index: 7, kind: input, shape index: {}]   ;;  %s458_s8 = inlined_call_operand.hbm [shape: f32[1,8,128], index: 8, kind: output, shape index: {}]  }
   0x1   :  { %13 = sst [smem:[#allocation3]] %s450_s0 }
   0x2   :  { %14 = sst [smem:[#allocation4]] %s451_s1 }
   0x3   :  { %16 = sst [smem:[#allocation6]] %s453_s3 }
   0x4   :  { %17 = vsyncpa [#allocation8], 0 }
   0x5   :  { %18 = vsyncpa [#allocation9], 0  ;;  %s32_s11 = sld [smem:[#allocation4]]  ;;  %s353_s12 = smov [#allocation7]  }
   0x6   :  { %s40_s13 = sshll.u32 %s353_s12, 4  ;;  %s305_s3 = scalar_lea.hbm %s455_s5, 8  ;;  %s41_s13 = int_to_ptr.vmem [resolvable:$true] %s40_s13 }
   0xb   :  { %s279_s14 = sshll.u32 %s32_s11, 3 }
   0xc   :  { %s36_s17 = scalar_lea.hbm %s455_s5, %s279_s14 }
   0xd   :  { %s38_s0 = sshll.u32 %s36_s17, 4  ;;  %s39_s0 = int_to_ptr.hbm [resolvable:$true] %s38_s0 }
   0xe   :  { %s301_s18 = sshra.s32 %s39_s0, 4  ;;  %s302_s18 = int_to_ptr.hbm [resolvable:$true] %s301_s18 }
   0xf   :  { %s303_s1 = scalar_lea.hbm %s302_s18, 8  ;;  %p306_p1 = scmp.lt.s32.totalorder %s302_s18, %s455_s5 }
  0x10   :  { %p304_p0 = scmp.ne.s32.totalorder %s302_s18, %s303_s1  ;;  %p307_p2 = scmp.lt.s32.totalorder %s305_s3, %s303_s1 }
  0x12   :  { %p308_p3 = por %p307_p2, %p306_p1 }
  0x14   :  { %p309_p4 = pnand %p308_p3, %p304_p0 }
  0x16   :  { %312 = shalt.err (!%p309_p4)
}
  0x17   :  { %43 = dma.hbm_to_vmem [thread:$0]  %s39_s0, 128, %s41_s13, [#allocation8]  }
  0x18   :  { %349 = dma.done.wait [#allocation8], 128  }
  0x19   :  { %350 = vsyncadd [#allocation8], 4294967168  ;;  %s85_s23 = sld [smem:[#allocation3]]  ;;  %v354_v0 = vmov 0.0   ;;  %p282_p7 = scmp.le.s32.totalorder %s452_s2, 0 }
  0x1a   :  { %114 = vst [vmem:[#allocation10] sm:$0xff] %v354_v0  ;;  %s103_s24 = sld [smem:[#allocation4]]  ;;  %s175_s14 = scvt.s32.f32 (!%p282_p7), %s452_s2 }
  0x1f   :  { %p86_p5 = scmp.lt.s32.totalorder %s85_s23, 0 }
  0x20   :  { %p104_p6 = scmp.lt.s32.totalorder %s103_s24, 0  ;;  %119 = sbr.rel (%p282_p7) target bundleno = 582 (0x246), region = 29 }
  0x21   :  { %s460_s23 = smov (!%p86_p5, %s85_s23), 0 }
  0x22   :  { %s462_s24 = smov (!%p104_p6, %s103_s24), 0  ;;  %s280_s25 = sshll.u32 %s460_s23, 3 }
  0x23   :  { %s89_s5 = scalar_lea.vmem %s454_s4, %s280_s25  ;;  %s99_s30 = scalar_lea.vmem %s456_s6, %s280_s25 }
  0x24   :  { %s106_s11 = scalar_lea.vmem %s457_s7, %s462_s24  ;;  %s435_s7 = sld [smem:[#allocation6]] (!%p282_p7) }
  0x25   :  { %v121_v1 = vld [vmem:[#allocation7] sm:$0xff]  ;;  %vm123_vm0 = vcmask 261120   ;;  %v355_v4 = vmov 0  }
  0x26   :  { %v150_v2 = vld [vmem:[%s99_s30] sm:$0xff]  ;;  %v122_v3 = vmul.f32 -2.0, %v121_v1  ;;  %297 = vset.pattern.permute.xlu0 %v355_v4 }
  0x27   :  { %154 = vperm.xlu0 %297, %v150_v2   ;;  %v120_v5 = vld [vmem:[%s89_s5] sm:$0xff] }
  0x28   :  { %283 = vmatpush.xpose.msk.msra.mxu0 %vm123_vm0, %v122_v3  ;;  %v298_v6 = vld [vmem:[%s106_s11] ss:$0 sm:$0xff] }
  0x2a   :  { %p285_p8 = scmp.le.s32.totalorder %s435_s7, 0 }
  0x2b   :  { %284 = vmatmul.msk.f32.vlgmr.msra.gmra.mxu0 %vm123_vm0, %v120_v5  ;;  %s181_s15 = sld [smem:[#allocation3]] (!%p285_p8) }
  0x2c   :  { %s182_s16 = sld [smem:[#allocation4]] (!%p285_p8) }
  0x31   :  { %s286_s17 = sshll.u32 (!%p285_p8), %s181_s15, 3 }
  0x32   :  { %s287_s0 = sshll.u32 (!%p285_p8), %s182_s16, 3 }
  0x99   :  { %v155_v7 = vpop.permute.xlu0 %154 }
  0x9a   :  { %v160_v8 = vadd.f32 %v298_v6, %v155_v7 }
  0xa8   :  { %v147_v9 = vpop.f32.mrf.mxu0 }
  0xa9   :  { %v161_v10 = vadd.f32 %v160_v8, %v147_v9 }
  0xab   :  { %v162_v11 = vmax.f32 %v161_v10, 0.0 }
  0xad   :  { %299 = vrsqrt.f32 %v162_v11  ;;  %vm170_vm1 = vcmp.eq.f32.partialorder %v162_v11, inf  ;;  %v173_v19 = vand.u32 2147483648, %v162_v11  ;;  %vm172_vm2 = vcmp.eq.f32.partialorder %v162_v11, 0.0 }
  0xb3   :  { %v300_v12 = vpop.eup %299 }
  0xb4   :  { %v164_v13 = vmul.f32 %v300_v12, %v162_v11 }
  0xb6   :  { %v165_v14 = vmul.f32 %v300_v12, %v164_v13 }
  0xb8   :  { %v166_v15 = vmul.f32 0.5, %v165_v14 }
  0xba   :  { %v167_v16 = vsub.f32 1.5, %v166_v15 }
  0xbc   :  { %v168_v17 = vmul.f32 %v300_v12, %v167_v16 }
  0xbd   :  { %180 = sbr.rel (%p285_p8) target bundleno = 389 (0x185), region = 33 }
  0xbe   :  { %v169_v18 = vmul.f32 %v168_v17, %v162_v11 }
  0xc0   :  { %v171_v20 = vsel %vm170_vm1, %v162_v11, %v169_v18 }
  0xc1   :  { %v174_v21 = vsel %vm172_vm2, %v173_v19, %v171_v20 }
  0xc2   :  { %v184_v22 = vlaneseq  ;;  %v186_v25 = vstv %s286_s17  ;;  %v191_v27 = vstv %s287_s0  ;;  %vm204_vm7 = vcmask 64512   ;;  %v202_v38 = vld [vmem:[#allocation10] sm:$0xff] }
  0xc4   :  { %v185_v23 = vshrl.u32 %v184_v22, 7  ;;  %v190_v24 = vand.u32 127, %v184_v22 }
  0xc6   :  { %v187_v26 = vadd.s32 %v186_v25, %v185_v23  ;;  %v192_v28 = vadd.s32 %v191_v27, %v190_v24 }
  0xc8   :  { %vm193_vm3 = vcmp.lt.s32.totalorder %v187_v26, 8  ;;  %vm194_vm4 = vcmp.lt.s32.totalorder %v192_v28, 8  ;;  %vm200_vm5 = vcmp.ne.s32.totalorder %v187_v26, %v192_v28 }
  0xc9   :  { %vm199_vm6 = vmand %vm193_vm3, %vm194_vm4 }
  0xca   :  { %vm201_vm8 = vmand %vm199_vm6, %vm200_vm5 }
  0xcb   :  { %v203_v29 = vsel %vm201_vm8, %v174_v21, 0.0 }
  0xcc   :  { %v205_v30 = vsel %vm204_vm7, %v203_v29, 0.0 }
  0xcd   :  { %206 = vadd.xlane.f32.xlu0 %v205_v30 }
 0x140   :  { %v207_v31 = vpop.xlane.xlu0 %206 }
 0x141   :  { %v208_v32 = vrot.slane %v207_v31, 4 }
 0x143   :  { %v209_v33 = vadd.f32 %v208_v32, %v207_v31 }
 0x145   :  { %v210_v34 = vrot.slane %v209_v33, 2 }
 0x147   :  { %v211_v35 = vadd.f32 %v210_v34, %v209_v33 }
 0x149   :  { %v212_v36 = vrot.slane %v211_v35, 1 }
 0x14b   :  { %v213_v37 = vadd.f32 %v212_v36, %v211_v35 }
 0x14d   :  { %289 = vpush %v213_v37 }
 0x17e   :  { %s290_s18 = spop %289 }
 0x17f   :  { %s215_s20 = smul.f32 %s290_s18, %s175_s14 }
 0x181   :  { %v216_v39 = vstv %s215_s20 }
 0x182   :  { %v217_v40 = vadd.f32 %v216_v39, %v202_v38 }
 0x184   :  { %218 = vst [vmem:[#allocation10] sm:$0xff] %v217_v40 }
 0x185 PF:  { %p288_p9 = scmp.gt.s32.totalorder %s435_s7, 0 }
 0x187   :  { %222 = sbr.rel (%p288_p9) target bundleno = 582 (0x246), region = 37 }
 0x18c   :  { %vm224_vm9 = vcmask 64512   ;;  %v223_v49 = vld [vmem:[#allocation10] sm:$0xff] }
 0x18d   :  { %v225_v41 = vsel %vm224_vm9, %v174_v21, 0.0 }
 0x18e   :  { %226 = vadd.xlane.f32.xlu0 %v225_v41 }
 0x201   :  { %v227_v42 = vpop.xlane.xlu0 %226 }
 0x202   :  { %v228_v43 = vrot.slane %v227_v42, 4 }
 0x204   :  { %v229_v44 = vadd.f32 %v228_v43, %v227_v42 }
 0x206   :  { %v230_v45 = vrot.slane %v229_v44, 2 }
 0x208   :  { %v231_v46 = vadd.f32 %v230_v45, %v229_v44 }
 0x20a   :  { %v232_v47 = vrot.slane %v231_v46, 1 }
 0x20c   :  { %v233_v48 = vadd.f32 %v232_v47, %v231_v46 }
 0x20e   :  { %291 = vpush %v233_v48 }
 0x23f   :  { %s292_s3 = spop %291 }
 0x240   :  { %s235_s23 = smul.f32 %s292_s3, %s175_s14 }
 0x242   :  { %v236_v50 = vstv %s235_s23 }
 0x243   :  { %v237_v51 = vadd.f32 %v236_v50, %v223_v49 }
 0x245   :  { %238 = vst [vmem:[#allocation10] sm:$0xff] %v237_v51 }
 0x246 PF:  { %s252_s26 = sshll.u32 %s458_s8, 4  ;;  %s356_s27 = smov [#allocation10]   ;;  %s253_s26 = int_to_ptr.hbm [resolvable:$true] %s252_s26 }
 0x247   :  { %s250_s5 = sshll.u32 %s356_s27, 4  ;;  %s251_s5 = int_to_ptr.vmem [resolvable:$true] %s250_s5 }
 0x24c   :  { %v242_v52 = vld [vmem:[#allocation10] sm:$0xff] }
 0x24d   :  { %v243_v53 = vmul.f32 0.015625, %v242_v52 }
 0x24f   :  { %244 = vst [vmem:[#allocation10] sm:$0xff] %v243_v53 }
 0x250   :  { %255 = dma.vmem_to_hbm [thread:$0]  %s251_s5, 128, %s253_s26, [#allocation9]  }
 0x251   :  { %351 = dma.done.wait [#allocation9], 128  }
 0x252   :  { %352 = vsyncadd [#allocation9], 4294967168 }
 0x253   :  { %260 = vsyncpa [#allocation8], 1 }
 0x254   :  { %261 = vsyncpa [#allocation9], 1 }

</bundles_post_ra>
